<compile_context>
chip_gen: v6e
topology: v6e:2x2x1
jax: 0.10.0
libtpu: 0.0.40
codegen_flags: <defaults>
</compile_context>

<pallas_src>
import jax
import jax.numpy as jnp
from jax.experimental import pallas as pl
from jax.experimental.pallas import tpu as pltpu


def _lrba_kernel(x1_ref, x2_ref, w1t_ref, w2t_ref, v_ref, repr_ref, alpha_ref):
    """One (batch, L-tile) grid step."""
    x1 = x1_ref[0]                      # (N, dim1)   matmul dtype
    x2 = x2_ref[0]                      # (TL, dim2)  matmul dtype

    # linear1 / linear2 (bias-free) on the MXU, f32 accumulation.
    p1 = jnp.dot(x1, w1t_ref[...], preferred_element_type=jnp.float32)   # (N, A)
    p2 = jnp.dot(x2, w2t_ref[...], preferred_element_type=jnp.float32)   # (TL, A)

    # Folded hidden_linear + target_linear:
    #   s[l, n] = sum_a tanh(p1[n, a] * p2[l, a]) * v[a]
    # (the additive scalar bh @ Wt^T + bt is constant over n and cancels in
    # the softmax below, so it is omitted -- outputs are identical).
    v = v_ref[...]                                         # (1, A) f32, lane-dense
    z = jnp.tanh(p1[None, :, :] * p2[:, None, :])          # (TL, N, A)  VPU + EUP
    s = jnp.sum(z * v[None, :, :], axis=-1)                # (TL, N)     VPU + XLU

    # Numerically-stable softmax over N (full N per grid step -> no online pass).
    m = jnp.max(s, axis=-1, keepdims=True)
    e = jnp.exp(s - m)
    denom = jnp.sum(e, axis=-1, keepdims=True)
    alpha = e * pl.reciprocal(denom, approx=True)          # (TL, N)

    alpha_ref[0] = alpha.astype(alpha_ref.dtype)
    # bmm(alpha, x1) for this (batch, L-tile) on the MXU.
    repr_ref[0] = jnp.dot(
        alpha.astype(x1.dtype), x1, preferred_element_type=jnp.float32
    ).astype(repr_ref.dtype)


def _auto_tile_l(L, N, A, budget_bytes=8 << 20):
    """Largest multiple-of-8 divisor of L whose (TL, N, A) f32 tanh
    intermediate stays under `budget_bytes`; falls back to the full L."""
    per_row = max(1, N * A * 4)
    cap = max(8, budget_bytes // per_row)
    best = None
    t = 8
    while t <= min(L, cap):
        if L % t == 0:
            best = t
        t += 8
    return best if best is not None else L


def lowrank_bilinear_attention(x1, x2, w1, w2, wh, bh, wt, bt, *,
                               tl=None, matmul_dtype=jnp.bfloat16):
    """x1: (B, N, dim1), x2: (B, L, dim2). Weights follow nn.Linear (out, in).

    matmul_dtype: dtype fed to the MXU matmuls (bf16 recommended on v5e/v6e;
    pass jnp.float32 for bit-faithful f32 matmuls). Accumulation is f32.
    """
    B, N, dim1 = x1.shape
    B2, L, dim2 = x2.shape
    assert B == B2
    A = w1.shape[0]

    # --- algebraic fold of hidden_linear + target_linear (exact) -----------
    #   target(hidden(tanh(z))) = tanh(z) @ (Wh^T Wt^T) + (bh @ Wt^T + bt)
    # Only the (1, A) row vector v = Wt @ Wh is needed; the scalar offset
    # cancels in the softmax over N.
    w1t = jnp.asarray(w1, jnp.float32).T.astype(matmul_dtype)     # (dim1, A)
    w2t = jnp.asarray(w2, jnp.float32).T.astype(matmul_dtype)     # (dim2, A)
    v = (jnp.asarray(wt, jnp.float32).reshape(1, A)
         @ jnp.asarray(wh, jnp.float32)).astype(jnp.float32)      # (1, A)
    del bh, bt  # cancel exactly in softmax (uniform shift over the N axis)

    # --- L-axis tiling -------------------------------------------------------
    if (tl is None or tl <= 0 or L % tl != 0 or (tl % 8 != 0 and tl != L)):
        tl = _auto_tile_l(L, N, A)
    lt = L // tl

    out_shapes = (
        jax.ShapeDtypeStruct((B, L, dim1), jnp.float32),   # label_repr
        jax.ShapeDtypeStruct((B, L, N), jnp.float32),      # alpha
    )

    grid_spec = pltpu.PrefetchScalarGridSpec(
        num_scalar_prefetch=0,
        grid=(B, lt),
        in_specs=[
            # x1: constant along the L-tile axis -> stays resident per batch.
            pl.BlockSpec((1, N, dim1), lambda b, l: (b, 0, 0)),
            pl.BlockSpec((1, tl, dim2), lambda b, l: (b, l, 0)),
            # Weights: constant for the whole grid.
            pl.BlockSpec((dim1, A), lambda b, l: (0, 0)),
            pl.BlockSpec((dim2, A), lambda b, l: (0, 0)),
            pl.BlockSpec((1, A), lambda b, l: (0, 0)),
        ],
        out_specs=[
            pl.BlockSpec((1, tl, dim1), lambda b, l: (b, l, 0)),
            pl.BlockSpec((1, tl, N), lambda b, l: (b, l, 0)),
        ],
    )

    label_repr, alpha = pl.pallas_call(
        _lrba_kernel,
        out_shape=out_shapes,
        grid_spec=grid_spec,
        compiler_params=pltpu.CompilerParams(
            # Every (b, l-tile) step is independent -> both axes parallel
            # (lets v7x's 2 TCs shard the grid).
            dimension_semantics=("parallel", "parallel")),
    )(x1.astype(matmul_dtype), x2.astype(matmul_dtype), w1t, w2t, v)
    return label_repr, alpha


def _reference(x1, x2, w1, w2, wh, bh, wt, bt):
    # Pure-JAX reference mirroring the PyTorch forward exactly (incl. biases).
    _x1 = jnp.einsum('bnd,ad->bna', x1, w1)[:, None, :, :]       # (B,1,N,A)
    _x2 = jnp.einsum('bld,ad->bla', x2, w2)[:, :, None, :]       # (B,L,1,A)
    z = jnp.tanh(_x1 * _x2)                                      # (B,L,N,A)
    t = jnp.einsum('blna,ha->blnh', z, wh) + bh                  # (B,L,N,A)
    s = jnp.einsum('blnh,h->bln', t, wt.reshape(-1)) + bt.reshape(())
    alpha = jax.nn.softmax(s, axis=-1)
    label_repr = jnp.einsum('bln,bnd->bld', alpha, x1)
    return label_repr, alpha


if __name__ == "__main__":
    B, N, dim1 = 2, 16, 32     # x1: (B, N, dim1)
    L, dim2 = 16, 24           # x2: (B, L, dim2)
    A = 64                     # att_dim (kept small for the example)

    key = jax.random.PRNGKey(0)
    k = jax.random.split(key, 8)
    x1 = jax.random.normal(k[0], (B, N, dim1), jnp.float32)
    x2 = jax.random.normal(k[1], (B, L, dim2), jnp.float32)
    # Deterministic parameter init (nn.Linear shapes: (out, in)).
    w1 = jax.random.normal(k[2], (A, dim1), jnp.float32) * 0.1
    w2 = jax.random.normal(k[3], (A, dim2), jnp.float32) * 0.1
    wh = jax.random.normal(k[4], (A, A), jnp.float32) * 0.1
    bh = jax.random.normal(k[5], (A,), jnp.float32) * 0.1
    wt = jax.random.normal(k[6], (1, A), jnp.float32) * 0.1
    bt = jax.random.normal(k[7], (1,), jnp.float32) * 0.1

    # tl=8 exercises the multi-tile L path (grid = (B, 2)).
    label_repr, alpha = lowrank_bilinear_attention(
        x1, x2, w1, w2, wh, bh, wt, bt, tl=8)
    jax.block_until_ready((label_repr, alpha))

    ref_repr, ref_alpha = _reference(x1, x2, w1, w2, wh, bh, wt, bt)
    # Tolerances account for bf16 MXU inputs + approx EUP reciprocal.
    assert jnp.allclose(label_repr, ref_repr, atol=2e-2, rtol=2e-2)
    assert jnp.allclose(alpha, ref_alpha, atol=2e-3, rtol=2e-2)

    print("KERNEL_OK")
</pallas_src>

<mosaic_0001>
module attributes {stable_mosaic.version = 11 : i64} {
  func.func @_lrba_kernel(%arg0: i32, %arg1: i32, %arg2: memref<1x16x32xbf16, #tpu.memory_space<vmem>>, %arg3: memref<1x8x24xbf16, #tpu.memory_space<vmem>>, %arg4: memref<32x64xbf16, #tpu.memory_space<vmem>>, %arg5: memref<24x64xbf16, #tpu.memory_space<vmem>>, %arg6: memref<1x64xf32, #tpu.memory_space<vmem>>, %arg7: memref<1x8x32xf32, #tpu.memory_space<vmem>>, %arg8: memref<1x8x16xf32, #tpu.memory_space<vmem>>) attributes {dimension_semantics = [#tpu.dimension_semantics<parallel>, #tpu.dimension_semantics<parallel>], iteration_bounds = array<i64: 2, 2>, scalar_prefetch = 0 : i64, scratch_operands = 0 : i64, tpu.core_type = #tpu.core_type<tc>, window_params = [{transform_indices = @transform_0, window_bounds = array<i64: 1, 16, 32>}, {transform_indices = @transform_1, window_bounds = array<i64: 1, 8, 24>}, {pipeline_mode = #tpu.pipeline_mode<synchronous>, transform_indices = @transform_2, window_bounds = array<i64: 32, 64>}, {pipeline_mode = #tpu.pipeline_mode<synchronous>, transform_indices = @transform_3, window_bounds = array<i64: 24, 64>}, {pipeline_mode = #tpu.pipeline_mode<synchronous>, transform_indices = @transform_4, window_bounds = array<i64: 1, 64>}, {transform_indices = @transform_5, window_bounds = array<i64: 1, 8, 32>}, {transform_indices = @transform_6, window_bounds = array<i64: 1, 8, 16>}]} {
    %c0 = arith.constant 0 : index
    %c0_0 = arith.constant 0 : index
    %c0_1 = arith.constant 0 : index
    %0 = vector.load %arg2[%c0, %c0_0, %c0_1] : memref<1x16x32xbf16, #tpu.memory_space<vmem>>, vector<1x16x32xbf16>
    %1 = vector.shape_cast %0 : vector<1x16x32xbf16> to vector<16x32xbf16>
    %c0_2 = arith.constant 0 : index
    %c0_3 = arith.constant 0 : index
    %c0_4 = arith.constant 0 : index
    %2 = vector.load %arg3[%c0_2, %c0_3, %c0_4] : memref<1x8x24xbf16, #tpu.memory_space<vmem>>, vector<1x8x24xbf16>
    %3 = vector.shape_cast %2 : vector<1x8x24xbf16> to vector<8x24xbf16>
    %c0_5 = arith.constant 0 : index
    %c0_6 = arith.constant 0 : index
    %4 = vector.load %arg4[%c0_5, %c0_6] : memref<32x64xbf16, #tpu.memory_space<vmem>>, vector<32x64xbf16>
    %cst = arith.constant dense<0.000000e+00> : vector<16x64xf32>
    %5 = tpu.matmul %1, %4, %cst {dimension_numbers = #tpu.dot_dimension_numbers<[1], [0], [0], [1], [0, 0, 1, 1], [], []>} : vector<16x32xbf16>, vector<32x64xbf16>, vector<16x64xf32> -> vector<16x64xf32>
    %c0_7 = arith.constant 0 : index
    %c0_8 = arith.constant 0 : index
    %6 = vector.load %arg5[%c0_7, %c0_8] : memref<24x64xbf16, #tpu.memory_space<vmem>>, vector<24x64xbf16>
    %cst_9 = arith.constant dense<0.000000e+00> : vector<8x64xf32>
    %7 = tpu.matmul %3, %6, %cst_9 {dimension_numbers = #tpu.dot_dimension_numbers<[1], [0], [0], [1], [0, 0, 1, 1], [], []>} : vector<8x24xbf16>, vector<24x64xbf16>, vector<8x64xf32> -> vector<8x64xf32>
    %c0_10 = arith.constant 0 : index
    %c0_11 = arith.constant 0 : index
    %8 = vector.load %arg6[%c0_10, %c0_11] : memref<1x64xf32, #tpu.memory_space<vmem>>, vector<1x64xf32>
    %9 = vector.shape_cast %5 : vector<16x64xf32> to vector<1x16x64xf32>
    %10 = vector.shape_cast %7 : vector<8x64xf32> to vector<8x1x64xf32>
    %11 = vector.broadcast %9 : vector<1x16x64xf32> to vector<8x16x64xf32>
    %12 = vector.broadcast %10 : vector<8x1x64xf32> to vector<8x16x64xf32>
    %13 = arith.mulf %11, %12 : vector<8x16x64xf32>
    %14 = math.tanh %13 : vector<8x16x64xf32>
    %15 = vector.shape_cast %8 : vector<1x64xf32> to vector<1x1x64xf32>
    %16 = vector.broadcast %15 : vector<1x1x64xf32> to vector<8x16x64xf32>
    %17 = arith.mulf %14, %16 : vector<8x16x64xf32>
    %cst_12 = arith.constant dense<0.000000e+00> : vector<8x16xf32>
    %18 = vector.multi_reduction <add>, %17, %cst_12 [2] : vector<8x16x64xf32> to vector<8x16xf32>
    %cst_13 = arith.constant dense<0xFF800000> : vector<8xf32>
    %19 = vector.multi_reduction <maximumf>, %18, %cst_13 [1] : vector<8x16xf32> to vector<8xf32>
    %20 = vector.shape_cast %19 : vector<8xf32> to vector<8x1xf32>
    %21 = vector.broadcast %20 : vector<8x1xf32> to vector<8x16xf32>
    %22 = arith.subf %18, %21 : vector<8x16xf32>
    %23 = math.exp %22 : vector<8x16xf32>
    %cst_14 = arith.constant dense<0.000000e+00> : vector<8xf32>
    %24 = vector.multi_reduction <add>, %23, %cst_14 [1] : vector<8x16xf32> to vector<8xf32>
    %25 = vector.shape_cast %24 : vector<8xf32> to vector<8x1xf32>
    %26 = tpu.reciprocal %25 {approx = true} : vector<8x1xf32> -> vector<8x1xf32>
    %27 = vector.broadcast %26 : vector<8x1xf32> to vector<8x16xf32>
    %28 = arith.mulf %23, %27 : vector<8x16xf32>
    %c0_15 = arith.constant 0 : index
    %c0_16 = arith.constant 0 : index
    %c0_17 = arith.constant 0 : index
    %29 = vector.load %arg8[%c0_15, %c0_16, %c0_17] : memref<1x8x16xf32, #tpu.memory_space<vmem>>, vector<1x8x16xf32>
    %30 = vector.shape_cast %29 : vector<1x8x16xf32> to vector<8x16xf32>
    %31 = vector.shape_cast %28 : vector<8x16xf32> to vector<1x8x16xf32>
    tpu.vector_store %arg8[%c0_15, %c0_16, %c0_17], %31 {strides = array<i32>} : memref<1x8x16xf32, #tpu.memory_space<vmem>>, vector<1x8x16xf32>,
    %32 = arith.truncf %28 : vector<8x16xf32> to vector<8x16xbf16>
    %cst_18 = arith.constant dense<0.000000e+00> : vector<8x32xf32>
    %33 = tpu.matmul %32, %1, %cst_18 {dimension_numbers = #tpu.dot_dimension_numbers<[1], [0], [0], [1], [0, 0, 1, 1], [], []>} : vector<8x16xbf16>, vector<16x32xbf16>, vector<8x32xf32> -> vector<8x32xf32>
    %c0_19 = arith.constant 0 : index
    %c0_20 = arith.constant 0 : index
    %c0_21 = arith.constant 0 : index
    %34 = vector.load %arg7[%c0_19, %c0_20, %c0_21] : memref<1x8x32xf32, #tpu.memory_space<vmem>>, vector<1x8x32xf32>
    %35 = vector.shape_cast %34 : vector<1x8x32xf32> to vector<8x32xf32>
    %36 = vector.shape_cast %33 : vector<8x32xf32> to vector<1x8x32xf32>
    tpu.vector_store %arg7[%c0_19, %c0_20, %c0_21], %36 {strides = array<i32>} : memref<1x8x32xf32, #tpu.memory_space<vmem>>, vector<1x8x32xf32>,
    return
  }
  func.func @transform_0(%arg0: i32, %arg1: i32) -> (i32, i32, i32) {
    %c0_i32 = arith.constant 0 : i32
    %c0_i32_0 = arith.constant 0 : i32
    %c0_i32_1 = arith.constant 0 : i32
    return %arg0, %c0_i32, %c0_i32_0 : i32, i32, i32
  }
  func.func @transform_1(%arg0: i32, %arg1: i32) -> (i32, i32, i32) {
    %c0_i32 = arith.constant 0 : i32
    %c0_i32_0 = arith.constant 0 : i32
    return %arg0, %arg1, %c0_i32 : i32, i32, i32
  }
  func.func @transform_2(%arg0: i32, %arg1: i32) -> (i32, i32) {
    %c0_i32 = arith.constant 0 : i32
    %c0_i32_0 = arith.constant 0 : i32
    %c0_i32_1 = arith.constant 0 : i32
    return %c0_i32, %c0_i32_0 : i32, i32
  }
  func.func @transform_3(%arg0: i32, %arg1: i32) -> (i32, i32) {
    %c0_i32 = arith.constant 0 : i32
    %c0_i32_0 = arith.constant 0 : i32
    %c0_i32_1 = arith.constant 0 : i32
    return %c0_i32, %c0_i32_0 : i32, i32
  }
  func.func @transform_4(%arg0: i32, %arg1: i32) -> (i32, i32) {
    %c0_i32 = arith.constant 0 : i32
    %c0_i32_0 = arith.constant 0 : i32
    %c0_i32_1 = arith.constant 0 : i32
    return %c0_i32, %c0_i32_0 : i32, i32
  }
  func.func @transform_5(%arg0: i32, %arg1: i32) -> (i32, i32, i32) {
    %c0_i32 = arith.constant 0 : i32
    %c0_i32_0 = arith.constant 0 : i32
    return %arg0, %arg1, %c0_i32 : i32, i32, i32
  }
  func.func @transform_6(%arg0: i32, %arg1: i32) -> (i32, i32, i32) {
    %c0_i32 = arith.constant 0 : i32
    %c0_i32_0 = arith.constant 0 : i32
    return %arg0, %arg1, %c0_i32 : i32, i32, i32
  }
}

</mosaic_0001>

<bundles_post_ra>
// kernel: tpu_custom_call.1
= control target key start
LH: loop header
LB: loop body
LE: loop exit
PB: predicated region body
PF: predicated region fallthrough
CT: control target
= control target key end

     0   :  { %s2953_s0 = inlined_call_operand.hbm [shape: bf16[2,16,32], index: 0, kind: input, shape index: {}]   ;;  %s2954_s1 = inlined_call_operand.hbm [shape: bf16[2,16,24], index: 1, kind: input, shape index: {}]   ;;  %s2955_s2 = inlined_call_operand.hbm [shape: bf16[32,64], index: 2, kind: input, shape index: {}]   ;;  %s2956_s3 = inlined_call_operand.hbm [shape: bf16[24,64], index: 3, kind: input, shape index: {}]   ;;  %s2957_s4 = inlined_call_operand.vmem [shape: f32[1,64], index: 4, kind: input, shape index: {}]   ;;  %s2958_s5 = inlined_call_operand.hbm [shape: f32[2,16,32], index: 5, kind: output, shape index: {0}]   ;;  %s2959_s6 = inlined_call_operand.hbm [shape: f32[2,16,16], index: 6, kind: output, shape index: {1}]  }
   0x1   :  { %2972 = sst [smem:[#allocation26_spill]] %s2953_s0 }
   0x2   :  { %2973 = sst [smem:[#allocation27_spill]] %s2955_s2 }
   0x3   :  { %2974 = sst [smem:[#allocation28_spill]] %s2956_s3 }
   0x4   :  { %2975 = sst [smem:[#allocation29_spill]] %s2957_s4 }
   0x5   :  { %2976 = sst [smem:[#allocation30_spill]] %s2958_s5 }
   0x6   :  { %2977 = sst [smem:[#allocation31_spill]] %s2959_s6 }
   0x7   :  { %12 = vsyncpa [#allocation3], 0 }
   0x8   :  { %14 = vsyncpa [#allocation3 + $0x1], 0 }
   0x9   :  { %15 = vsyncpa [#allocation6], 0 }
   0xa   :  { %17 = vsyncpa [#allocation6 + $0x1], 0 }
   0xb   :  { %18 = vsyncpa [#allocation9], 0 }
   0xc   :  { %19 = vsyncpa [#allocation4], 0 }
   0xd   :  { %21 = vsyncpa [#allocation4 + $0x1], 0 }
   0xe   :  { %22 = vsyncpa [#allocation12], 0 }
   0xf   :  { %24 = vsyncpa [#allocation12 + $0x1], 0  ;;  %s2241_s21 = smov 0   ;;  %s2243_s22 = smov 0  }
  0x10   :  { %s2245_s23 = smov 0   ;;  %s2247_s24 = smov 0  }
  0x11   :  { %s2249_s25 = smov 0   ;;  %s2251_s26 = smov 0  }
  0x12   :  { %s2253_s27 = smov 0   ;;  %s2255_s28 = smov 0  }
  0x13   :  { %s2257_s29 = smov 0   ;;  %s2259_s30 = smov 0  }
  0x14   :  { %s2261_s7 = smov 0  }
  0x15 LB: > { %2978 = sst [smem:[#allocation19_spill]] %s2152_s21  ;;  %s2295_s8 = sadd.s32 4294967295, %s2192_s7   ;;  %s2192_s7 = sphi %s2261_s7, %s30_s7   ;;  %s2188_s30 = sphi %s2259_s30, %s3026_s30   ;;  %s2184_s29 = sphi %s2257_s29, %s3025_s29   ;;  %s2180_s28 = sphi %s2255_s28, %s3024_s28   ;;  %s2176_s27 = sphi %s2253_s27, %s3023_s27   ;;  %s2172_s26 = sphi %s2251_s26, %s3022_s26   ;;  %s2168_s25 = sphi %s2249_s25, %s3021_s25   ;;  %s2164_s24 = sphi %s2247_s24, %s3020_s24   ;;  %s2160_s23 = sphi %s2245_s23, %s3019_s23   ;;  %s2156_s22 = sphi %s2243_s22, %s3018_s22   ;;  %s2152_s21 = sphi %s2241_s21, %s3017_s21  }
  0x16   : > { %2979 = sst [smem:[#allocation20_spill]] %s2176_s27  ;;  %p62_p0 = scmp.ne.s32.totalorder %s2168_s25, %s2164_s24 }
  0x17   : > { %2980 = sst [smem:[#allocation21_spill]] %s2180_s28  ;;  %p2963_p1 = scmp.eq.s32.totalorder %s2295_s8, 0 }
  0x18   : > { %p179_p2 = scmp.eq.s32.totalorder %s2295_s8, 3  ;;  %p1645_p3 = scmp.ge.s32.totalorder %s2192_s7, 1 }
  0x19   : > { %p220_p4 = scmp.lt.s32.totalorder %s2192_s7, 5  ;;  %p2304_p5 = por %p2963_p1, %p62_p0 }
  0x1a   : > { %s2194_s11 = smov [#allocation7]   ;;  %s2195_s14 = smov [#allocation8]  }
  0x1b   : > { %p2308_p6 = pnand %p1645_p3, %p220_p4  ;;  %s232_s12 = sshll.u32 %s2194_s11, 4  ;;  %s233_s12 = int_to_ptr.vmem [resolvable:$true] %s232_s12 }
  0x1c   : > { %s245_s15 = sshll.u32 %s2195_s14, 4  ;;  %s1933_s16 = scalar_lea.vmem %s233_s12, 256  ;;  %s246_s15 = int_to_ptr.vmem [resolvable:$true] %s245_s15 }
  0x1d   : > { %p1726_p7 = pneg %p2308_p6  ;;  %p1934_p10 = scmp.ne.s32.totalorder %s233_s12, %s1933_s16 }
  0x1e   : > { %p1941_p13 = scmp.lt.s32.totalorder %s233_s12, %s233_s12  ;;  %p1942_p0 = scmp.lt.s32.totalorder %s1933_s16, %s1933_s16 }
  0x1f   : > { %p2316_p8 = pnand %p1726_p7, %p2963_p1 }
  0x20   : > { %p1943_p3 = por %p1942_p0, %p1941_p13 }
  0x21   : > { %p1924_p9 = pneg %p2316_p8 }
  0x23   : > { %p1936_p11 = pnand %p1934_p10, %p1924_p9 }
  0x25   : > { %p1937_p12 = pneg %p1936_p11 }
  0x27   : > { %p1944_p4 = pnand %p1943_p3, %p1937_p12 }
  0x29   : > { %1947 = shalt.err (!%p1944_p4)
}
  0x2a   : > { %s2961_s17 = smov 64   ;;  %s2962_s18 = smov 4  }
  0x2b   : > { %s2984_s2 = sld [smem:[#allocation27_spill]]  ;;  %s1959_s24 = scalar_lea.vmem %s246_s15, 192 }
  0x2c   : > { %p1960_p7 = scmp.ne.s32.totalorder %s246_s15, %s1959_s24  ;;  %p1967_p12 = scmp.lt.s32.totalorder %s246_s15, %s246_s15 }
  0x2d   : > { %p1968_p13 = scmp.lt.s32.totalorder %s1959_s24, %s1959_s24 }
  0x2e   : > { %p1962_p10 = pnand %p1960_p7, %p1924_p9 }
  0x2f   : > { %p1969_p0 = por %p1968_p13, %p1967_p12 }
  0x30   : > { %p1963_p11 = pneg %p1962_p10 }
  0x31   : > { %1729 = dma.hbm_to_vmem [thread:$0]  (!%p2316_p8), %s2984_s2, 256, %s233_s12, [#allocation6], %s2961_s17, %s2961_s17, %s2962_s18  }
  0x32   : > { %p1970_p3 = pnand %p1969_p0, %p1963_p11 }
  0x34   : > { %1973 = shalt.err (!%p1970_p3)
}
  0x35   : > { %s2985_s3 = sld [smem:[#allocation28_spill]]  ;;  %p56_p9 = scmp.ne.s32.totalorder %s2172_s26, %s2168_s25 }
  0x36   : > { %p57_p4 = scmp.eq.s32.totalorder %s2192_s7, 0  ;;  %p1749_p7 = scmp.lt.s32.totalorder %s2192_s7, 4 }
  0x37   : > { %s262_s13 = sand.u32 1, %s2172_s26   ;;  %s1679_s19 = sshll.u32 %s2188_s30, 7 }
  0x38   : > { %p58_p10 = por %p57_p4, %p56_p9  ;;  %s1649_s16 = sshll.u32 %s262_s13, 3 }
  0x39   : > { %s2986_s0 = sld [smem:[#allocation26_spill]]  ;;  %s266_s14 = scalar_lea.vmem [#allocation2], %s1649_s16 }
  0x3a   : > { %s273_s2 = sshll.u32 %s266_s14, 4  ;;  %p2358_p11 = pnand %p1749_p7, %p58_p10  ;;  %s274_s2 = int_to_ptr.vmem [resolvable:$true] %s273_s2 }
  0x3b   : > { %1732 = dma.hbm_to_vmem [thread:$0]  (!%p2316_p8), %s2985_s3, 192, %s246_s15, [#allocation9], %s2961_s17, %s2961_s17, %s2962_s18  }
  0x3c   : > { %s263_s15 = scalar_lea.sflag [#allocation3], %s262_s13  ;;  %p1976_p8 = pneg %p2358_p11 }
  0x3d   : > { %s1987_s12 = scalar_lea.vmem %s274_s2, 128  ;;  %s2198_s17 = smov [#allocation2]  }
  0x3e   : > { %p1988_p12 = scmp.ne.s32.totalorder %s274_s2, %s1987_s12  ;;  %s1992_s18 = sshll.u32 %s2198_s17, 4  ;;  %s1993_s18 = int_to_ptr.vmem [resolvable:$false] %s1992_s18 }
  0x3f   : > { %s272_s11 = scalar_lea.hbm %s2986_s0, %s1679_s19  ;;  %s1994_s19 = scalar_lea.vmem %s1993_s18, 256 }
  0x40   : > { %p1990_p13 = pnand %p1988_p12, %p1976_p8  ;;  %p1995_p3 = scmp.lt.s32.totalorder %s274_s2, %s1993_s18 }
  0x41   : > { %p1996_p9 = scmp.lt.s32.totalorder %s1994_s19, %s1987_s12 }
  0x42   : > { %p1991_p0 = pneg %p1990_p13 }
  0x43   : > { %p1997_p1 = por %p1996_p9, %p1995_p3 }
  0x45   : > { %p1998_p10 = pnand %p1997_p1, %p1991_p0 }
  0x47   : > { %2001 = shalt.err (!%p1998_p10)
}
  0x48   : > { %s2988_s16 = smov 4   ;;  %s2989_s20 = smov 64  }
  0x49   : > { %1736 = dma.hbm_to_vmem [thread:$0]  (!%p2358_p11), %s272_s11, 128, %s274_s2, %s263_s15, %s2989_s20, %s2989_s20, %s2988_s16  }
  0x4a   : > { %s1644_s17 = sadd.s32 4294967294, %s2192_s7   ;;  %s39_s18 = sadd.s32 1, %s2184_s29 }
  0x4b   : > { %p40_p1 = scmp.ge.s32.totalorder %s39_s18, 2  ;;  %s42_s5 = sadd.s32 1, %s2188_s30 }
  0x4c   : > { %s77_s12 = sadd.s32 1, %s2160_s23  ;;  %p84_p8 = scmp.ne.s32.totalorder %s2160_s23, %s2156_s22 }
  0x4d   : > { %s3028_s18 = smov (%p40_p1, %s39_s18), 0  ;;  %s3030_s5 = smov (!%p40_p1, %s42_s5), %s2188_s30 }
  0x4e   : > { %2990 = sst [smem:[#allocation22_spill]] %s3028_s18  ;;  %s73_s13 = ssub.s32 %s2184_s29, %s3028_s18 }
  0x4f   : > { %p2382_p11 = por %p84_p8, %p57_p4  ;;  %p44_p12 = scmp.ge.s32.totalorder %s3030_s5, 2 }
  0x50   : > { %p90_p13 = scmp.ne.s32.totalorder %s2156_s22, %s2152_s21  ;;  %p2390_p0 = por %p179_p2, %p84_p8 }
  0x51   : > { %p185_p3 = scmp.eq.s32.totalorder %s1644_s17, 3  ;;  %s3032_s5 = smov (%p44_p12, %s3030_s5), 0 }
  0x52   : > { %s2992_s24 = scalar_select %p2390_p0, 1, 0 }
  0x53   : > { %2994 = sst [smem:[#allocation24_spill]] %s3032_s5  ;;  %p2995_p9 = scmp.eq.s32.totalorder %s2295_s8, 0 }
  0x54   : > { %2993 = sst [smem:[#allocation23_spill]] %s2992_s24  ;;  %p2402_p4 = por %p185_p3, %p90_p13 }
  0x55   : > { %p2398_p10 = por %p90_p13, %p2995_p9  ;;  %s46_s15 = ssub.s32 %s2188_s30, %s3032_s5 }
  0x56   : > { %s2997_s14 = scalar_select %p2402_p4, 1, 0 }
  0x57   : > { %s283_s19 = sand.u32 1, %s2192_s7   ;;  %p47_p2 = scmp.eq.s32.totalorder %s46_s15, 0 }
  0x58   : > { %2998 = sst [smem:[#allocation25_spill]] %s2997_s14  ;;  %s74_s16 = sor.u32 %s73_s13, %s46_s15 }
  0x59   : > { %p75_p1 = scmp.eq.s32.totalorder %s74_s16, 0  ;;  %s2999_s20 = sadd.s32 1, %s2172_s26 }
  0x5a   : > { %s2412_s17 = scalar_select %p47_p2, %s2172_s26, %s2999_s20  }
  0x5b   : > { %s2415_s0 = scalar_select %p75_p1, %s2160_s23, %s77_s12  }
  0x5c   : > { %s285_s3 = sand.u32 1, %s2160_s23   ;;  %s1653_s18 = sshll.u32 %s2188_s30, 1 }
  0x5d   : > { %s1652_s21 = sshll.u32 %s285_s3, 2  ;;  %s292_s6 = sadd.s32 %s2184_s29, %s1653_s18 }
  0x5e   : > { %s1654_s24 = sshll.u32 %s292_s6, 6  ;;  %s287_s14 = scalar_lea.vmem [#allocation5], %s1652_s21 }
  0x5f   : > { %s294_s5 = scalar_lea.hbm %s2954_s1, %s1654_s24  ;;  %s296_s4 = sshll.u32 %s287_s14, 4  ;;  %s297_s4 = int_to_ptr.vmem [resolvable:$true] %s296_s4 }
  0x60   : > { %p2427_p8 = pnand %p1749_p7, %p2382_p11  ;;  %s284_s12 = scalar_lea.sflag [#allocation6], %s283_s19 }
  0x61   : > { %s2015_s3 = scalar_lea.vmem %s297_s4, 64  ;;  %s2199_s6 = smov [#allocation5]  }
  0x62   : > { %p2004_p12 = pneg %p2427_p8  ;;  %p2016_p13 = scmp.ne.s32.totalorder %s297_s4, %s2015_s3 }
  0x63   : > { %s2020_s27 = sshll.u32 %s2199_s6, 4  ;;  %s2021_s27 = int_to_ptr.vmem [resolvable:$false] %s2020_s27 }
  0x64   : > { %p2018_p3 = pnand %p2016_p13, %p2004_p12  ;;  %s2022_s21 = scalar_lea.vmem %s2021_s27, 128 }
  0x65   : > { %p2023_p2 = scmp.lt.s32.totalorder %s297_s4, %s2021_s27  ;;  %p2024_p1 = scmp.lt.s32.totalorder %s2022_s21, %s2015_s3 }
  0x66   : > { %p2019_p9 = pneg %p2018_p3 }
  0x67   : > { %p2025_p4 = por %p2024_p1, %p2023_p2 }
  0x69   : > { %p2026_p0 = pnand %p2025_p4, %p2019_p9 }
  0x6b   : > { %2029 = shalt.err (!%p2026_p0)
}
  0x6c   : > { %1739 = dma.hbm_to_vmem [thread:$0]  (!%p2427_p8), %s294_s5, 64, %s297_s4, %s284_s12  }
  0x6d   : > { %305 = sbr.rel (%p2308_p6) target bundleno = 1409 (0x581), region = 40  ;;  %s307_s28 = sand.u32 (!%p2308_p6), 1, %s2168_s25  }
  0x6e   : > { %s2438_s18 = sshll.u32 (!%p2308_p6), %s307_s28, 3  ;;  %s308_s2 = scalar_lea.sflag (!%p2308_p6), [#allocation3], %s307_s28 }
  0x6f   : > { %s311_s24 = scalar_lea.vmem (!%p2308_p6), [#allocation2], %s2438_s18 }
  0x72   : > { %2127 = dma.done.wait (%p2304_p5), %s308_s2, 128  }
  0x73   : > { %2129 = vsyncadd (%p2304_p5), %s308_s2, 4294967168  ;;  %s316_s4 = sand.u32 1, %s2295_s8   ;;  %s2447_s5 = sand.u32 1, %s2156_s22  }
  0x74   : > { %s1657_s10 = sshll.u32 %s2447_s5, 2  ;;  %s317_s14 = scalar_lea.sflag [#allocation6], %s316_s4 }
  0x75   : > { %s320_s15 = scalar_lea.vmem [#allocation5], %s1657_s10 }
  0x76   : > { %2131 = dma.done.wait (%p2398_p10), %s317_s14, 64  }
  0x77   : > { %2133 = vsyncadd (%p2398_p10), %s317_s14, 4294967232  ;;  %p3001_p6 = scmp.eq.s32.totalorder %s2295_s8, 0 }
  0x79   : > { %2135 = dma.done.wait (%p3001_p6), [#allocation6], 256   ;;  %p3002_p5 = pmov %p3001_p6 }
  0x7b   : > { %2137 = vsyncadd (%p3002_p5), [#allocation6], 4294967040  ;;  %p3003_p7 = pmov %p3002_p5 }
  0x7c   : > { %p3004_p11 = pmov %p3002_p5 }
  0x7d   : > { %2139 = dma.done.wait (%p3003_p7), [#allocation9], 192  }
  0x7e   : > { %2141 = vsyncadd (%p3004_p11), [#allocation9], 4294967104  ;;  %v2200_v0 = vmov 0.0   ;;  %vm2201_vm0 = vmmov 0   ;;  %vm453_vm1 = vcmask 1043456   ;;  %v1852_v2 = vld [vmem:[#allocation7 + $0x8] sm:$0xff]   ;;  %v503_v10 = vlaneseq }
  0x7f   : > { %1696 = vmatprep.subr.bf16.mxu1 %v2200_v0  ;;  %1688 = vmatprep.subr.bf16.mxu0 %v2200_v0  ;;  %v1851_v1 = vld [vmem:[#allocation8 + $0x8] ss:$0 sps:$4 sm:$0xff]   ;;  %v1853_v4 = vld [vmem:[#allocation8] sm:$0xff]   ;;  %v1854_v5 = vld [vmem:[#allocation7] sm:$0xff]   ;;  %vm449_vm2 = vcmask 195584   ;;  %vm392_vm3 = vcmask 261120  }
  0x80   : > { %1700 = vmatprep.mubr.msk.bf16.mxu1 %vm2201_vm0, %v2200_v0  ;;  %1692 = vmatprep.mubr.msk.bf16.mxu0 %vm2201_vm0, %v2200_v0  ;;  %v455_v3 = vsel %vm453_vm1, %v1851_v1, 0  ;;  %v1855_v6 = vld [vmem:[%s311_s24] sm:$0xff]   ;;  %v370_v7 = vld [vmem:[%s320_s15] sm:$0xf]  ;;  %v2202_v8 = vmov 1966171168  }
  0x81   : > { %1697 = vmatpush3.bf16.msra.mxu1 %v455_v3  ;;  %1689 = vmatpush3.bf16.msra.mxu0 %v1852_v2  ;;  %v501_v9 = vunpack.c.l.s4 %v2202_v8  ;;  %v2467_v12 = vshrl.u32 %v503_v10, 7  ;;  %s3005_s11 = sld [smem:[#allocation29_spill]]  ;;  %vm642_vm4 = vcmask 523264   ;;  %vm718_vm5 = vcmask 130112   ;;  %s1660_s20 = sshll.u32 %s2447_s5, 3 }
  0x82   : > { %1698 = vmatprep.subr.bf16.mxu1 %v2200_v0  ;;  %1690 = vmatprep.subr.bf16.mxu0 %v2200_v0  ;;  %vm783_vm6 = vcmask 1041409   ;;  %vm785_vm7 = vcmask 1042434   ;;  %vm787_vm8 = vcmask 1043459   ;;  %vm789_vm9 = vcmask 1044484   ;;  %s3006_s19 = sld [smem:[#allocation21_spill]]  ;;  %s366_s12 = scalar_lea.vmem [#allocation11], %s1660_s20 }
  0x83   : > { %v502_v11 = vunpack.c.0.s8 %v501_v9  ;;  %v2473_v18 = vsub.s32 0, %v2467_v12  ;;  %vm791_vm10 = vcmask 1045509   ;;  %vm793_vm11 = vcmask 1046534   ;;  %s3007_s16 = sld [smem:[#allocation20_spill]]  ;;  %s1482_s24 = sshll.u32 %s366_s12, 4  ;;  %s1483_s24 = int_to_ptr.vmem [resolvable:$true] %s1482_s24 }
  0x84   : > { %vm795_vm12 = vcmask 1047559   ;;  %vm798_vm13 = vcmask 130048   ;;  %s3008_s13 = sld [smem:[#allocation23_spill]]  ;;  %s1452_s4 = scalar_lea.sflag [#allocation12], %s2447_s5 }
  0x85   : > { %1699 = vmatpush3.bf16.msra.mxu1 %v1853_v4  ;;  %1691 = vmatpush3.bf16.msra.mxu0 %v1854_v5  ;;  %v505_v13 = vsub.s32 %v502_v11, %v2467_v12  ;;  %s3009_s18 = sld [smem:[#allocation31_spill]]  ;;  %s2030_s10 = scalar_lea.vmem %s1483_s24, 128 }
  0x86   : > { %1704 = vmatprep.subr.bf16.mxu0 %v2200_v0  ;;  %p2031_p0 = scmp.ne.s32.totalorder %s1483_s24, %s2030_s10  ;;  %s2204_s14 = smov [#allocation11]  }
  0x87   : > { %v2497_v53 = vld [vmem:[%s3005_s11] ss:$0 sm:$0xff]  ;;  %s2034_s15 = sshll.u32 %s2204_s14, 4  ;;  %s2035_s15 = int_to_ptr.vmem [resolvable:$false] %s2034_s15 }
  0x88   : > { %1701 = vmatmul.mubr.msk.bf16.vlgmr.msra.gmra.mxu1 %vm449_vm2, %v370_v7  ;;  %1693 = vmatmul.mubr.msk.bf16.vlgmr.msra.gmra.mxu0 %vm392_vm3, %v1855_v6  ;;  %s1673_s3 = sshll.u32 %s3006_s19, 1  ;;  %s2036_s8 = scalar_lea.vmem %s2035_s15, 256 }
  0x89   : > { %1705 = vmatpush3.bf16.msra.mxu0 %v1855_v6  ;;  %1706 = vmatprep.mubr.msk.bf16.mxu0 %vm2201_vm0, %v2200_v0  ;;  %s2862_s6 = sadd.s32 %s3007_s16, %s1673_s3  ;;  %p2037_p12 = scmp.lt.s32.totalorder %s1483_s24, %s2035_s15 }
  0x8a   : > { %s1674_s27 = sshll.u32 %s2862_s6, 7  ;;  %p3010_p10 = scmp.ne.s32.totalorder %s3008_s13, 0 }
  0x8b   : > { %s1480_s2 = scalar_lea.hbm %s3009_s18, %s1674_s27  ;;  %p2038_p13 = scmp.lt.s32.totalorder %s2036_s8, %s2030_s10 }
  0x8c   : > { %p2032_p4 = pnand %p2031_p0, %p3010_p10 }
  0x8d   : > { %p2039_p3 = por %p2038_p13, %p2037_p12 }
  0x8e   : > { %p2033_p8 = pneg %p2032_p4 }
  0x90   : > { %p2040_p9 = pnand %p2039_p3, %p2033_p8 }
 0x148   : > { %v491_v14 = vpop.f32.mrf.mxu1  ;;  %v2470_v15 = vpop.f32.mrf.mxu0 }
 0x149   : > { %v499_v16 = vcombine.high %v491_v14, %v491_v14  ;;  %v506_v17 = vrot.slane %v491_v14, %v505_v13 }
 0x14a   : > { %v1702_v19 = vpop.f32.mrf.mxu1  ;;  %v1694_v20 = vpop.f32.mrf.mxu0 }
 0x14b   : > { %v513_v21 = vrot.slane %v499_v16, %v505_v13  ;;  %v514_v22 = vcombine.high %v506_v17, %v506_v17  ;;  %v522_v23 = vrot.slane %v506_v17, %v505_v13 }
 0x14c   : > { %v494_v24 = vpop.f32.mrf.mxu1  ;;  %v2475_v25 = vpop.f32.mrf.mxu0 }
 0x14d   : > { %v529_v26 = vrot.slane %v513_v21, %v505_v13  ;;  %v536_v27 = vrot.slane %v514_v22, %v505_v13  ;;  %v544_v28 = vcombine.high %v522_v23, %v522_v23  ;;  %v551_v29 = vrot.slane %v522_v23, %v2473_v18 }
 0x14e   : > { %v1703_v30 = vpop.f32.mrf.mxu1  ;;  %v1695_v31 = vpop.f32.mrf.mxu0  ;;  %v515_v36 = vcombine.high %v513_v21, %v513_v21 }
 0x14f   : > { %v555_v32 = vrot.slane %v536_v27, %v2473_v18  ;;  %v559_v33 = vrot.slane %v544_v28, %v2473_v18  ;;  %v588_v34 = vmul.f32 %v551_v29, %v2470_v15  ;;  %v589_v35 = vmul.f32 %v551_v29, %v2475_v25 }
 0x150   : > { %v546_v37 = vcombine.high %v536_v27, %v536_v27  ;;  %v567_v38 = vrot.slane %v529_v26, %v2473_v18  ;;  %v543_v43 = vrot.slane %v515_v36, %v505_v13  ;;  %v545_v47 = vcombine.high %v529_v26, %v529_v26 }
 0x151   : > { %1856 = vtanh.f32 %v588_v34  ;;  %v590_v39 = vmul.f32 %v555_v32, %v2470_v15  ;;  %v591_v40 = vmul.f32 %v555_v32, %v2475_v25  ;;  %v592_v41 = vmul.f32 %v559_v33, %v2470_v15 }
 0x152   : > { %1858 = vtanh.f32 %v589_v35  ;;  %v593_v42 = vmul.f32 %v559_v33, %v2475_v25  ;;  %v563_v44 = vrot.slane %v546_v37, %v2473_v18  ;;  %v596_v45 = vmul.f32 %v567_v38, %v2470_v15 }
 0x153   : > { %1860 = vtanh.f32 %v590_v39  ;;  %v597_v46 = vmul.f32 %v567_v38, %v2475_v25  ;;  %v571_v48 = vrot.slane %v543_v43, %v2473_v18  ;;  %v547_v51 = vcombine.high %v543_v43, %v543_v43 }
 0x154   : > { %1862 = vtanh.f32 %v591_v40  ;;  %v594_v49 = vmul.f32 %v563_v44, %v2470_v15  ;;  %v595_v50 = vmul.f32 %v563_v44, %v2475_v25  ;;  %v575_v52 = vrot.slane %v545_v47, %v2473_v18 }
 0x155   : > { %1864 = vtanh.f32 %v592_v41  ;;  %v598_v54 = vmul.f32 %v571_v48, %v2470_v15  ;;  %v599_v58 = vmul.f32 %v571_v48, %v2475_v25  ;;  %v579_v60 = vrot.slane %v547_v51, %v2473_v18 }
 0x156   : > { %1866 = vtanh.f32 %v593_v42  ;;  %v600_v61 = vmul.f32 %v575_v52, %v2470_v15  ;;  %v601_v5 = vmul.f32 %v575_v52, %v2475_v25 }
 0x157   : > { %1868 = vtanh.f32 %v596_v45  ;;  %v602_v9 = vmul.f32 %v579_v60, %v2470_v15  ;;  %v603_v16 = vmul.f32 %v579_v60, %v2475_v25 }
 0x158   : > { %1870 = vtanh.f32 %v597_v46 }
 0x159   : > { %1872 = vtanh.f32 %v594_v49 }
 0x15a   : > { %1874 = vtanh.f32 %v595_v50 }
 0x15b   : > { %1876 = vtanh.f32 %v598_v54 }
 0x15c   : > { %1878 = vtanh.f32 %v599_v58 }
 0x15d   : > { %1880 = vtanh.f32 %v600_v61 }
 0x15e   : > { %v1857_v55 = vpop.eup %1856  ;;  %1882 = vtanh.f32 %v601_v5 }
 0x15f   : > { %v1859_v56 = vpop.eup %1858  ;;  %v626_v57 = vmul.f32 %v1857_v55, %v2497_v53  ;;  %1884 = vtanh.f32 %v602_v9 }
 0x160   : > { %v1861_v59 = vpop.eup %1860  ;;  %v627_v1 = vmul.f32 %v1859_v56, %v2497_v53  ;;  %1886 = vtanh.f32 %v603_v16 }
 0x161   : > { %v1863_v62 = vpop.eup %1862  ;;  %v643_v63 = vsel %vm642_vm4, %v626_v57, 0.0  ;;  %v628_v0 = vmul.f32 %v1861_v59, %v2497_v53 }
 0x162   : > { %v1865_v2 = vpop.eup %1864  ;;  %644 = vadd.xlane.f32.xlu0 %v643_v63  ;;  %v629_v4 = vmul.f32 %v1863_v62, %v2497_v53  ;;  %v646_v7 = vsel %vm642_vm4, %v627_v1, 0.0 }
 0x163   : > { %v649_v3 = vsel %vm642_vm4, %v628_v0, 0.0  ;;  %v1867_v6 = vpop.eup %1866  ;;  %v630_v8 = vmul.f32 %v1865_v2, %v2497_v53 }
 0x164   : > { %650 = vadd.xlane.f32.xlu1 %v649_v3  ;;  %v1869_v11 = vpop.eup %1868  ;;  %v652_v13 = vsel %vm642_vm4, %v629_v4, 0.0  ;;  %v631_v14 = vmul.f32 %v1867_v6, %v2497_v53 }
 0x165   : > { %v1871_v17 = vpop.eup %1870  ;;  %v655_v19 = vsel %vm642_vm4, %v630_v8, 0.0  ;;  %v634_v20 = vmul.f32 %v1869_v11, %v2497_v53 }
 0x166   : > { %647 = vadd.xlane.f32.xlu0 %v646_v7  ;;  %v1873_v21 = vpop.eup %1872  ;;  %v658_v15 = vsel %vm642_vm4, %v631_v14, 0.0  ;;  %v635_v22 = vmul.f32 %v1871_v17, %v2497_v53 }
 0x167   : > { %v1875_v23 = vpop.eup %1874  ;;  %v667_v24 = vsel %vm642_vm4, %v634_v20, 0.0  ;;  %v632_v25 = vmul.f32 %v1873_v21, %v2497_v53 }
 0x168   : > { %653 = vadd.xlane.f32.xlu1 %v652_v13  ;;  %v1877_v26 = vpop.eup %1876  ;;  %v670_v27 = vsel %vm642_vm4, %v635_v22, 0.0  ;;  %v633_v28 = vmul.f32 %v1875_v23, %v2497_v53 }
 0x169   : > { %v1879_v29 = vpop.eup %1878  ;;  %v661_v30 = vsel %vm642_vm4, %v632_v25, 0.0  ;;  %v636_v31 = vmul.f32 %v1877_v26, %v2497_v53 }
 0x16a   : > { %656 = vadd.xlane.f32.xlu0 %v655_v19  ;;  %v1881_v32 = vpop.eup %1880  ;;  %v664_v33 = vsel %vm642_vm4, %v633_v28, 0.0  ;;  %v637_v34 = vmul.f32 %v1879_v29, %v2497_v53 }
 0x16b   : > { %v1883_v35 = vpop.eup %1882  ;;  %v673_v36 = vsel %vm642_vm4, %v636_v31, 0.0  ;;  %v638_v37 = vmul.f32 %v1881_v32, %v2497_v53 }
 0x16c   : > { %659 = vadd.xlane.f32.xlu1 %v658_v15  ;;  %v1885_v38 = vpop.eup %1884  ;;  %v676_v39 = vsel %vm642_vm4, %v637_v34, 0.0  ;;  %v639_v40 = vmul.f32 %v1883_v35, %v2497_v53 }
 0x16d   : > { %v1887_v41 = vpop.eup %1886  ;;  %v679_v42 = vsel %vm642_vm4, %v638_v37, 0.0  ;;  %v640_v43 = vmul.f32 %v1885_v38, %v2497_v53  ;;  %v2203_v38 = vmov 0  }
 0x16e   : > { %668 = vadd.xlane.f32.xlu0 %v667_v24  ;;  %v682_v44 = vsel %vm642_vm4, %v639_v40, 0.0  ;;  %v641_v45 = vmul.f32 %v1887_v41, %v2497_v53  ;;  %v708_v53 = vand.u32 127, %v503_v10  ;;  %1849 = vset.pattern.permute.xlu1 %v2203_v38 }
 0x16f   : > { %v685_v46 = vsel %vm642_vm4, %v640_v43, 0.0  ;;  %1850 = vset.pattern.permute.xlu0 %v2203_v38  ;;  %v825_v43 = vsub.s32 5, %v2467_v12 }
 0x170   : > { %671 = vadd.xlane.f32.xlu1 %v670_v27  ;;  %v688_v47 = vsel %vm642_vm4, %v641_v45, 0.0  ;;  %v713_v56 = vadd.s32 4294967288, %v708_v53  ;;  %v2563_v61 = vsub.s32 %v708_v53, %v2467_v12  ;;  %v829_v53 = vsub.s32 6, %v2467_v12 }
 0x172   : > { %662 = vadd.xlane.f32.xlu0 %v661_v30  ;;  %v2558_v59 = vsub.s32 %v713_v56, %v2467_v12 }
 0x174   : > { %665 = vadd.xlane.f32.xlu1 %v664_v33 }
 0x176   : > { %674 = vadd.xlane.f32.xlu0 %v673_v36 }
 0x178   : > { %677 = vadd.xlane.f32.xlu1 %v676_v39  ;;  %v809_v39 = vsub.s32 1, %v2467_v12 }
 0x17a   : > { %680 = vadd.xlane.f32.xlu0 %v679_v42 }
 0x17c   : > { %683 = vadd.xlane.f32.xlu1 %v682_v44 }
 0x17e   : > { %686 = vadd.xlane.f32.xlu0 %v685_v46  ;;  %v813_v46 = vsub.s32 2, %v2467_v12 }
 0x180   : > { %689 = vadd.xlane.f32.xlu1 %v688_v47 }
 0x1eb   : > { %v2538_v48 = vpop.xlane.xlu0 %644 }
 0x1ec   : > { %v712_v5 = vrot.slane %v2538_v48, %v2563_v61 }
 0x1ed   : > { %v2540_v49 = vpop.xlane.xlu1 %650 }
 0x1ee   : > { %v723_v0 = vrot.slane %v2540_v49, %v2563_v61 }
 0x1ef   : > { %v2542_v50 = vpop.xlane.xlu0 %647 }
 0x1f0   : > { %v717_v1 = vrot.slane %v2542_v50, %v2558_v59 }
 0x1f1   : > { %v2544_v51 = vpop.xlane.xlu1 %653 }
 0x1f2   : > { %v727_v62 = vrot.slane %v2544_v51, %v2558_v59  ;;  %v719_v11 = vsel %vm718_vm5, %v717_v1, %v712_v5 }
 0x1f3   : > { %v2546_v52 = vpop.xlane.xlu0 %656 }
 0x1f4   : > { %v732_v3 = vrot.slane %v2546_v52, %v2563_v61  ;;  %v728_v6 = vsel %vm718_vm5, %v727_v62, %v723_v0 }
 0x1f5   : > { %v2548_v54 = vpop.xlane.xlu1 %659  ;;  %v784_v16 = vsel %vm783_vm6, %v728_v6, %v719_v11 }
 0x1f6   : > { %v736_v10 = vrot.slane %v2548_v54, %v2558_v59 }
 0x1f7   : > { %v2551_v55 = vpop.xlane.xlu0 %668 }
 0x1f8   : > { %v737_v8 = vsel %vm718_vm5, %v736_v10, %v732_v3  ;;  %v750_v22 = vrot.slane %v2551_v55, %v2563_v61  ;;  %v817_v3 = vsub.s32 3, %v2467_v12 }
 0x1f9   : > { %v2553_v57 = vpop.xlane.xlu1 %671  ;;  %v786_v20 = vsel %vm785_vm7, %v737_v8, %v784_v16 }
 0x1fa   : > { %v754_v17 = vrot.slane %v2553_v57, %v2558_v59 }
 0x1fb   : > { %v2555_v58 = vpop.xlane.xlu0 %662 }
 0x1fc   : > { %v741_v7 = vrot.slane %v2555_v58, %v2563_v61  ;;  %v755_v27 = vsel %vm718_vm5, %v754_v17, %v750_v22 }
 0x1fd   : > { %v2560_v60 = vpop.xlane.xlu1 %665 }
 0x1fe   : > { %v745_v2 = vrot.slane %v2560_v60, %v2558_v59 }
 0x1ff   : > { %v2569_v63 = vpop.xlane.xlu0 %674 }
 0x200   : > { %v746_v13 = vsel %vm718_vm5, %v745_v2, %v741_v7  ;;  %v759_v21 = vrot.slane %v2569_v63, %v2563_v61 }
 0x201   : > { %v2579_v4 = vpop.xlane.xlu1 %677  ;;  %v788_v23 = vsel %vm787_vm8, %v746_v13, %v786_v20 }
 0x202   : > { %v763_v14 = vrot.slane %v2579_v4, %v2558_v59  ;;  %v790_v32 = vsel %vm789_vm9, %v755_v27, %v788_v23 }
 0x203   : > { %v2587_v9 = vpop.xlane.xlu0 %680 }
 0x204   : > { %v768_v24 = vrot.slane %v2587_v9, %v2563_v61  ;;  %v764_v26 = vsel %vm718_vm5, %v763_v14, %v759_v21 }
 0x205   : > { %v2596_v19 = vpop.xlane.xlu1 %683  ;;  %v792_v33 = vsel %vm791_vm10, %v764_v26, %v790_v32 }
 0x206   : > { %v772_v15 = vrot.slane %v2596_v19, %v2558_v59 }
 0x207   : > { %v2608_v25 = vpop.xlane.xlu0 %686 }
 0x208   : > { %v773_v29 = vsel %vm718_vm5, %v772_v15, %v768_v24  ;;  %v777_v30 = vrot.slane %v2608_v25, %v2563_v61 }
 0x209   : > { %v2612_v28 = vpop.xlane.xlu1 %689  ;;  %v794_v35 = vsel %vm793_vm11, %v773_v29, %v792_v33 }
 0x20a   : > { %v781_v31 = vrot.slane %v2612_v28, %v2558_v59 }
 0x20c   : > { %v782_v34 = vsel %vm718_vm5, %v781_v31, %v777_v30 }
 0x20d   : > { %v796_v36 = vsel %vm795_vm12, %v782_v34, %v794_v35 }
 0x20e   : > { %v799_v37 = vsel %vm798_vm13, %v796_v36, -inf }
 0x20f   : > { %800 = vmax.xlane.f32.xlu0 %v799_v37 }
 0x298   : > { %v801_v40 = vpop.xlane.xlu0 %800 }
 0x299   : > { %v806_v41 = vrot.slane %v801_v40, %v2473_v18  ;;  %v810_v42 = vrot.slane %v801_v40, %v809_v39  ;;  %v2637_v56 = vrot.slane %v801_v40, %v825_v43  ;;  %v814_v0 = vrot.slane %v801_v40, %v813_v46 }
 0x29a   : > { %v818_v11 = vrot.slane %v801_v40, %v817_v3 }
 0x29b   : > { %v843_v44 = vsub.f32 %v2538_v48, %v806_v41  ;;  %v844_v45 = vsub.f32 %v2542_v50, %v806_v41  ;;  %v845_v47 = vsub.f32 %v2540_v49, %v810_v42  ;;  %v846_v1 = vsub.f32 %v2544_v51, %v810_v42 }
 0x29c   : > { %v833_v50 = vsub.s32 7, %v2467_v12  ;;  %v830_v49 = vrot.slane %v801_v40, %v829_v53  ;;  %v853_v2 = vsub.f32 %v2569_v63, %v2637_v56  ;;  %v847_v5 = vsub.f32 %v2546_v52, %v814_v0 }
 0x29d   : > { %v859_v62 = vmul.f32 1.442695, %v843_v44  ;;  %v861_v10 = vmul.f32 1.442695, %v844_v45  ;;  %v863_v48 = vmul.f32 1.442695, %v845_v47  ;;  %v848_v13 = vsub.f32 %v2548_v54, %v814_v0 }
 0x29e   : > { %v865_v6 = vmul.f32 1.442695, %v846_v1  ;;  %v834_v51 = vrot.slane %v801_v40, %v833_v50  ;;  %v855_v7 = vsub.f32 %v2587_v9, %v830_v49  ;;  %v879_v8 = vmul.f32 1.442695, %v853_v2 }
 0x29f   : > { %1888 = vpow2.f32 %v859_v62  ;;  %v867_v14 = vmul.f32 1.442695, %v847_v5  ;;  %v821_v52 = vsub.s32 4, %v2467_v12  ;;  %v849_v17 = vsub.f32 %v2555_v58, %v818_v11 }
 0x2a0   : > { %1890 = vpow2.f32 %v861_v10  ;;  %v857_v63 = vsub.f32 %v2608_v25, %v834_v51  ;;  %v883_v16 = vmul.f32 1.442695, %v855_v7  ;;  %v869_v20 = vmul.f32 1.442695, %v848_v13 }
 0x2a1   : > { %1892 = vpow2.f32 %v863_v48  ;;  %v822_v54 = vrot.slane %v801_v40, %v821_v52  ;;  %v850_v22 = vsub.f32 %v2560_v60, %v818_v11  ;;  %v871_v23 = vmul.f32 1.442695, %v849_v17 }
 0x2a2   : > { %1894 = vpow2.f32 %v865_v6  ;;  %v887_v15 = vmul.f32 1.442695, %v857_v63  ;;  %v856_v34 = vsub.f32 %v2596_v19, %v830_v49 }
 0x2a3   : > { %1896 = vpow2.f32 %v879_v8  ;;  %v851_v24 = vsub.f32 %v2551_v55, %v822_v54  ;;  %v873_v25 = vmul.f32 1.442695, %v850_v22  ;;  %v852_v29 = vsub.f32 %v2553_v57, %v822_v54 }
 0x2a4   : > { %1898 = vpow2.f32 %v867_v14  ;;  %v854_v55 = vsub.f32 %v2579_v4, %v2637_v56  ;;  %v858_v4 = vsub.f32 %v2612_v28, %v834_v51  ;;  %v885_v37 = vmul.f32 1.442695, %v856_v34 }
 0x2a5   : > { %1900 = vpow2.f32 %v883_v16  ;;  %v875_v60 = vmul.f32 1.442695, %v851_v24  ;;  %v877_v32 = vmul.f32 1.442695, %v852_v29 }
 0x2a6   : > { %1902 = vpow2.f32 %v869_v20  ;;  %v881_v35 = vmul.f32 1.442695, %v854_v55  ;;  %v889_v40 = vmul.f32 1.442695, %v858_v4 }
 0x2a7   : > { %1904 = vpow2.f32 %v887_v15 }
 0x2a8   : > { %1906 = vpow2.f32 %v871_v23 }
 0x2a9   : > { %1908 = vpow2.f32 %v873_v25 }
 0x2aa   : > { %1910 = vpow2.f32 %v875_v60 }
 0x2ab   : > { %1912 = vpow2.f32 %v877_v32 }
 0x2ac   : > { %v2658_v21 = vpop.eup %1888  ;;  %1914 = vpow2.f32 %v881_v35 }
 0x2ad   : > { %v2660_v9 = vpop.eup %1890  ;;  %908 = vperm.xlu1 %1849, %v2658_v21   ;;  %1916 = vpow2.f32 %v885_v37 }
 0x2ae   : > { %911 = vperm.xlu0 %1850, %v2660_v9   ;;  %v2667_v58 = vpop.eup %1892  ;;  %1918 = vpow2.f32 %v889_v40 }
 0x2af   : > { %v2671_v26 = vpop.eup %1894 }
 0x2b0   : > { %v2674_v27 = vpop.eup %1896 }
 0x2b1   : > { %914 = vperm.xlu1 %1849, %v2667_v58   ;;  %v2678_v30 = vpop.eup %1898 }
 0x2b2   : > { %938 = vperm.xlu0 %1850, %v2674_v27   ;;  %v2681_v31 = vpop.eup %1900 }
 0x2b3   : > { %v2686_v33 = vpop.eup %1902 }
 0x2b4   : > { %v2689_v57 = vpop.eup %1904 }
 0x2b5   : > { %917 = vperm.xlu1 %1849, %v2671_v26   ;;  %v2693_v36 = vpop.eup %1906 }
 0x2b6   : > { %944 = vperm.xlu0 %1850, %v2681_v31   ;;  %v2697_v38 = vpop.eup %1908 }
 0x2b7   : > { %v2700_v41 = vpop.eup %1910 }
 0x2b8   : > { %v2703_v19 = vpop.eup %1912 }
 0x2b9   : > { %920 = vperm.xlu1 %1849, %v2678_v30   ;;  %v2706_v42 = vpop.eup %1914 }
 0x2ba   : > { %950 = vperm.xlu0 %1850, %v2689_v57   ;;  %v2709_v28 = vpop.eup %1916 }
 0x2bb   : > { %v2712_v44 = vpop.eup %1918 }
 0x2bd   : > { %923 = vperm.xlu1 %1849, %v2686_v33  }
 0x2c1   : > { %926 = vperm.xlu1 %1849, %v2693_v36  }
 0x2c5   : > { %929 = vperm.xlu1 %1849, %v2697_v38  }
 0x2c9   : > { %932 = vperm.xlu1 %1849, %v2700_v41  }
 0x2cd   : > { %935 = vperm.xlu1 %1849, %v2703_v19  }
 0x2d1   : > { %941 = vperm.xlu1 %1849, %v2706_v42  }
 0x2d5   : > { %947 = vperm.xlu1 %1849, %v2709_v28  }
 0x2d9   : > { %953 = vperm.xlu1 %1849, %v2712_v44  }
 0x328   : > { %v909_v45 = vpop.permute.xlu1 %908 }
 0x329   : > { %v912_v1 = vpop.permute.xlu0 %911  ;;  %v958_v13 = vrot.slane %v909_v45, %v2563_v61 }
 0x32a   : > { %v962_v11 = vrot.slane %v912_v1, %v2558_v59 }
 0x32c   : > { %v915_v47 = vpop.permute.xlu1 %914  ;;  %v963_v25 = vsel %vm718_vm5, %v962_v11, %v958_v13 }
 0x32d   : > { %v939_v2 = vpop.permute.xlu0 %938  ;;  %v967_v14 = vrot.slane %v915_v47, %v2563_v61 }
 0x32e   : > { %v1003_v29 = vrot.slane %v939_v2, %v2563_v61 }
 0x330   : > { %v918_v56 = vpop.permute.xlu1 %917 }
 0x331   : > { %v971_v6 = vrot.slane %v918_v56, %v2558_v59  ;;  %v945_v51 = vpop.permute.xlu0 %944 }
 0x332   : > { %v1012_v32 = vrot.slane %v945_v51, %v2563_v61 }
 0x333   : > { %v972_v20 = vsel %vm718_vm5, %v971_v6, %v967_v14 }
 0x334   : > { %v921_v62 = vpop.permute.xlu1 %920  ;;  %v1027_v34 = vsel %vm783_vm6, %v972_v20, %v963_v25 }
 0x335   : > { %v976_v16 = vrot.slane %v921_v62, %v2563_v61  ;;  %v951_v35 = vpop.permute.xlu0 %950 }
 0x336   : > { %v1021_v62 = vrot.slane %v951_v35, %v2563_v61 }
 0x338   : > { %v924_v10 = vpop.permute.xlu1 %923 }
 0x339   : > { %v980_v7 = vrot.slane %v924_v10, %v2558_v59 }
 0x33b   : > { %v981_v22 = vsel %vm718_vm5, %v980_v7, %v976_v16 }
 0x33c   : > { %v927_v0 = vpop.permute.xlu1 %926  ;;  %v1028_v37 = vsel %vm785_vm7, %v981_v22, %v1027_v34 }
 0x33d   : > { %v985_v15 = vrot.slane %v927_v0, %v2563_v61 }
 0x340   : > { %v930_v48 = vpop.permute.xlu1 %929 }
 0x341   : > { %v989_v63 = vrot.slane %v930_v48, %v2558_v59 }
 0x343   : > { %v990_v60 = vsel %vm718_vm5, %v989_v63, %v985_v15 }
 0x344   : > { %v933_v49 = vpop.permute.xlu1 %932  ;;  %v1029_v45 = vsel %vm787_vm8, %v990_v60, %v1028_v37 }
 0x345   : > { %v994_v23 = vrot.slane %v933_v49, %v2563_v61 }
 0x348   : > { %v936_v5 = vpop.permute.xlu1 %935 }
 0x349   : > { %v998_v17 = vrot.slane %v936_v5, %v2558_v59 }
 0x34b   : > { %v999_v4 = vsel %vm718_vm5, %v998_v17, %v994_v23 }
 0x34c   : > { %v942_v8 = vpop.permute.xlu1 %941  ;;  %v1030_v10 = vsel %vm789_vm9, %v999_v4, %v1029_v45 }
 0x34d   : > { %v1007_v54 = vrot.slane %v942_v8, %v2558_v59 }
 0x34f   : > { %v1008_v40 = vsel %vm718_vm5, %v1007_v54, %v1003_v29 }
 0x350   : > { %v948_v24 = vpop.permute.xlu1 %947  ;;  %v1031_v1 = vsel %vm791_vm10, %v1008_v40, %v1030_v10 }
 0x351   : > { %v1016_v55 = vrot.slane %v948_v24, %v2558_v59 }
 0x353   : > { %v1017_v47 = vsel %vm718_vm5, %v1016_v55, %v1012_v32 }
 0x354   : > { %v954_v56 = vpop.permute.xlu1 %953  ;;  %v1032_v49 = vsel %vm793_vm11, %v1017_v47, %v1031_v1 }
 0x355   : > { %v1025_v0 = vrot.slane %v954_v56, %v2558_v59 }
 0x357   : > { %v1026_v48 = vsel %vm718_vm5, %v1025_v0, %v1021_v62 }
 0x358   : > { %v1033_v2 = vsel %vm795_vm12, %v1026_v48, %v1032_v49 }
 0x359   : > { %v1035_v5 = vsel %vm798_vm13, %v1033_v2, 0.0 }
 0x35a   : > { %1036 = vadd.xlane.f32.xlu0 %v1035_v5 }
 0x3e3   : > { %v1037_v6 = vpop.xlane.xlu0 %1036 }
 0x3e4   : > { %1920 = vrcp.f32 %v1037_v6 }
 0x3f1   : > { %v1921_v51 = vpop.eup %1920 }
 0x3f2   : > { %v1059_v7 = vrot.slane %v1921_v51, %v821_v52  ;;  %v1043_v8 = vrot.slane %v1921_v51, %v2473_v18  ;;  %v1071_v11 = vrot.slane %v1921_v51, %v833_v50  ;;  %v1047_v13 = vrot.slane %v1921_v51, %v809_v39 }
 0x3f3   : > { %v1063_v32 = vrot.slane %v1921_v51, %v825_v43 }
 0x3f4   : > { %v1088_v14 = vmul.f32 %v2700_v41, %v1059_v7  ;;  %v2756_v63 = vmul.f32 %v2703_v19, %v1059_v7  ;;  %v1080_v16 = vmul.f32 %v2658_v21, %v1043_v8  ;;  %v2760_v17 = vmul.f32 %v2660_v9, %v1043_v8 }
 0x3f5   : > { %v1094_v52 = vmul.f32 %v2689_v57, %v1071_v11  ;;  %v2764_v18 = vmul.f32 %v2712_v44, %v1071_v11  ;;  %v1082_v39 = vmul.f32 %v2667_v58, %v1047_v13  ;;  %v1083_v21 = vmul.f32 %v2671_v26, %v1047_v13 }
 0x3f6   : > { %v1245_v50 = vpack.c.bf16 %v2756_v63, %v1088_v14  ;;  %v1241_v20 = vpack.c.bf16 %v2760_v17, %v1080_v16  ;;  %v1051_v44 = vrot.slane %v1921_v51, %v813_v46  ;;  %v1055_v26 = vrot.slane %v1921_v51, %v817_v3 }
 0x3f7   : > { %v1248_v19 = vpack.c.bf16 %v2764_v18, %v1094_v52  ;;  %v1242_v57 = vpack.c.bf16 %v1083_v21, %v1082_v39  ;;  %v1090_v3 = vmul.f32 %v2674_v27, %v1063_v32 }
 0x3f8   : > { %v1265_v41 = vunpack.c.l.b16 %v1245_v50  ;;  %v1257_v15 = vunpack.c.l.b16 %v1241_v20  ;;  %v1258_v54 = vunpack.c.h.b16 %v1241_v20  ;;  %v1084_v23 = vmul.f32 %v2678_v30, %v1051_v44 }
 0x3f9   : > { %v1271_v9 = vunpack.c.l.b16 %v1248_v19  ;;  %v1259_v22 = vunpack.c.l.b16 %v1242_v57  ;;  %v1085_v58 = vmul.f32 %v2686_v33, %v1051_v44  ;;  %v1260_v24 = vunpack.c.h.b16 %v1242_v57 }
 0x3fa   : > { %1298 = vperm.xlu0 %1850, %v1265_v41   ;;  %1274 = vperm.xlu1 %1849, %v1257_v15   ;;  %v1086_v60 = vmul.f32 %v2693_v36, %v1055_v26  ;;  %v1087_v46 = vmul.f32 %v2697_v38, %v1055_v26  ;;  %v1067_v36 = vrot.slane %v1921_v51, %v829_v53  ;;  %v1266_v4 = vunpack.c.h.b16 %v1245_v50 }
 0x3fb   : > { %v1243_v25 = vpack.c.bf16 %v1085_v58, %v1084_v23  ;;  %v1091_v38 = vmul.f32 %v2706_v42, %v1063_v32  ;;  %v1272_v42 = vunpack.c.h.b16 %v1248_v19 }
 0x3fc   : > { %v1244_v30 = vpack.c.bf16 %v1087_v46, %v1086_v60  ;;  %v1092_v35 = vmul.f32 %v2681_v31, %v1067_v36  ;;  %v1093_v43 = vmul.f32 %v2709_v28, %v1067_v36 }
 0x3fd   : > { %v1261_v29 = vunpack.c.l.b16 %v1243_v25  ;;  %v1262_v55 = vunpack.c.h.b16 %v1243_v25  ;;  %v1246_v37 = vpack.c.bf16 %v1091_v38, %v1090_v3 }
 0x3fe   : > { %1316 = vperm.xlu0 %1850, %v1271_v9   ;;  %1277 = vperm.xlu1 %1849, %v1258_v54   ;;  %v1263_v33 = vunpack.c.l.b16 %v1244_v30  ;;  %v1264_v34 = vunpack.c.h.b16 %v1244_v30  ;;  %v1247_v45 = vpack.c.bf16 %v1093_v43, %v1092_v35 }
 0x3ff   : > { %v1267_v40 = vunpack.c.l.b16 %v1246_v37  ;;  %v1268_v27 = vunpack.c.h.b16 %v1246_v37 }
 0x400   : > { %v1269_v12 = vunpack.c.l.b16 %v1247_v45  ;;  %v1270_v53 = vunpack.c.h.b16 %v1247_v45 }
 0x402   : > { %1113 = vperm.xlu0 %1850, %v1080_v16   ;;  %1280 = vperm.xlu1 %1849, %v1259_v22  }
 0x406   : > { %1119 = vperm.xlu0 %1850, %v1082_v39   ;;  %1283 = vperm.xlu1 %1849, %v1260_v24  }
 0x40a   : > { %1125 = vperm.xlu0 %1850, %v1084_v23   ;;  %1286 = vperm.xlu1 %1849, %v1261_v29  }
 0x40e   : > { %1131 = vperm.xlu0 %1850, %v1086_v60   ;;  %1289 = vperm.xlu1 %1849, %v1262_v55  }
 0x412   : > { %1137 = vperm.xlu0 %1850, %v1088_v14   ;;  %1292 = vperm.xlu1 %1849, %v1263_v33  }
 0x416   : > { %1143 = vperm.xlu0 %1850, %v1090_v3   ;;  %1295 = vperm.xlu1 %1849, %v1264_v34  }
 0x41a   : > { %1149 = vperm.xlu0 %1850, %v1092_v35   ;;  %1301 = vperm.xlu1 %1849, %v1266_v4  }
 0x41e   : > { %1155 = vperm.xlu0 %1850, %v1094_v52   ;;  %1304 = vperm.xlu1 %1849, %v1267_v40  }
 0x422   : > { %1307 = vperm.xlu1 %1849, %v1268_v27  }
 0x426   : > { %1310 = vperm.xlu1 %1849, %v1269_v12  }
 0x42a   : > { %1313 = vperm.xlu1 %1849, %v1270_v53  }
 0x42e   : > { %1319 = vperm.xlu1 %1849, %v1272_v42  }
 0x432   : > { %1116 = vperm.xlu1 %1849, %v2760_v17  }
 0x436   : > { %1122 = vperm.xlu1 %1849, %v1083_v21  }
 0x43a   : > { %1128 = vperm.xlu1 %1849, %v1085_v58  }
 0x43e   : > { %1134 = vperm.xlu1 %1849, %v1087_v46  }
 0x442   : > { %1140 = vperm.xlu1 %1849, %v2756_v63  }
 0x446   : > { %1146 = vperm.xlu1 %1849, %v1091_v38  }
 0x44a   : > { %1152 = vperm.xlu1 %1849, %v1093_v43  }
 0x44e   : > { %1158 = vperm.xlu1 %1849, %v2764_v18  }
 0x475   : > { %v1275_v31 = vpop.permute.xlu1 %1274  ;;  %v1299_v1 = vpop.permute.xlu0 %1298 }
 0x476   : > { %v1324_v18 = vrot.slane %v1275_v31, %v2563_v61  ;;  %v1360_v41 = vrot.slane %v1299_v1, %v2563_v61 }
 0x479   : > { %v1278_v28 = vpop.permute.xlu1 %1277  ;;  %v1317_v2 = vpop.permute.xlu0 %1316 }
 0x47a   : > { %v1328_v13 = vrot.slane %v1278_v28, %v2558_v59  ;;  %v1387_v46 = vrot.slane %v1317_v2, %v2563_v61 }
 0x47c   : > { %v1329_v21 = vsel %vm718_vm5, %v1328_v13, %v1324_v18 }
 0x47d   : > { %v1281_v47 = vpop.permute.xlu1 %1280  ;;  %v2790_v6 = vpop.permute.xlu0 %1113 }
 0x47e   : > { %v1333_v14 = vrot.slane %v1281_v47, %v2563_v61 }
 0x481   : > { %v1284_v56 = vpop.permute.xlu1 %1283  ;;  %v1120_v16 = vpop.permute.xlu0 %1119 }
 0x482   : > { %v1337_v7 = vrot.slane %v1284_v56, %v2558_v59  ;;  %v1172_v28 = vrot.slane %v1120_v16, %v2563_v61 }
 0x484   : > { %v1338_v50 = vsel %vm718_vm5, %v1337_v7, %v1333_v14 }
 0x485   : > { %v1287_v62 = vpop.permute.xlu1 %1286  ;;  %v1393_v44 = vsel %vm783_vm6, %v1338_v50, %v1329_v21  ;;  %v1126_v25 = vpop.permute.xlu0 %1125 }
 0x486   : > { %v1342_v17 = vrot.slane %v1287_v62, %v2563_v61  ;;  %v1181_v62 = vrot.slane %v1126_v25, %v2563_v61 }
 0x489   : > { %v1290_v10 = vpop.permute.xlu1 %1289  ;;  %v1132_v35 = vpop.permute.xlu0 %1131 }
 0x48a   : > { %v1346_v8 = vrot.slane %v1290_v10, %v2558_v59  ;;  %v1190_v1 = vrot.slane %v1132_v35, %v2563_v61 }
 0x48c   : > { %v1347_v15 = vsel %vm718_vm5, %v1346_v8, %v1342_v17 }
 0x48d   : > { %v1293_v0 = vpop.permute.xlu1 %1292  ;;  %v1394_v58 = vsel %vm785_vm7, %v1347_v15, %v1393_v44  ;;  %v1138_v37 = vpop.permute.xlu0 %1137 }
 0x48e   : > { %v1351_v20 = vrot.slane %v1293_v0, %v2563_v61  ;;  %v1163_v0 = vrot.slane %v2790_v6, %v2563_v61  ;;  %v1199_v2 = vrot.slane %v1138_v37, %v2563_v61 }
 0x491   : > { %v1296_v48 = vpop.permute.xlu1 %1295  ;;  %v1144_v27 = vpop.permute.xlu0 %1143 }
 0x492   : > { %v1355_v63 = vrot.slane %v1296_v48, %v2558_v59  ;;  %v1208_v7 = vrot.slane %v1144_v27, %v2563_v61 }
 0x494   : > { %v1356_v9 = vsel %vm718_vm5, %v1355_v63, %v1351_v20 }
 0x495   : > { %v1302_v49 = vpop.permute.xlu1 %1301  ;;  %v1395_v26 = vsel %vm787_vm8, %v1356_v9, %v1394_v58  ;;  %v1150_v53 = vpop.permute.xlu0 %1149 }
 0x496   : > { %v1364_v52 = vrot.slane %v1302_v49, %v2558_v59  ;;  %v1217_v13 = vrot.slane %v1150_v53, %v2563_v61 }
 0x498   : > { %v1365_v22 = vsel %vm718_vm5, %v1364_v52, %v1360_v41 }
 0x499   : > { %v1305_v5 = vpop.permute.xlu1 %1304  ;;  %v1396_v55 = vsel %vm789_vm9, %v1365_v22, %v1395_v26  ;;  %v1156_v14 = vpop.permute.xlu0 %1155 }
 0x49a   : > { %v1369_v54 = vrot.slane %v1305_v5, %v2563_v61 }
 0x49d   : > { %v1308_v51 = vpop.permute.xlu1 %1307 }
 0x49e   : > { %v1373_v39 = vrot.slane %v1308_v51, %v2558_v59 }
 0x4a0   : > { %v1374_v24 = vsel %vm718_vm5, %v1373_v39, %v1369_v54  ;;  %v1226_v39 = vrot.slane %v1156_v14, %v2563_v61 }
 0x4a1   : > { %v1311_v11 = vpop.permute.xlu1 %1310  ;;  %v1397_v33 = vsel %vm791_vm10, %v1374_v24, %v1396_v55 }
 0x4a2   : > { %v1378_v23 = vrot.slane %v1311_v11, %v2563_v61 }
 0x4a5   : > { %v1314_v19 = vpop.permute.xlu1 %1313 }
 0x4a6   : > { %v1382_v57 = vrot.slane %v1314_v19, %v2558_v59 }
 0x4a8   : > { %v1383_v29 = vsel %vm718_vm5, %v1382_v57, %v1378_v23 }
 0x4a9   : > { %v1320_v60 = vpop.permute.xlu1 %1319  ;;  %v1398_v32 = vsel %vm793_vm11, %v1383_v29, %v1397_v33 }
 0x4aa   : > { %v1391_v30 = vrot.slane %v1320_v60, %v2558_v59 }
 0x4ac   : > { %v1392_v3 = vsel %vm718_vm5, %v1391_v30, %v1387_v46 }
 0x4ad   : > { %v1399_v34 = vsel %vm795_vm12, %v1392_v3, %v1398_v32  ;;  %v1117_v36 = vpop.permute.xlu1 %1116 }
 0x4ae   : > { %v1400_v38 = vpack.c.b16 %v1399_v34, %v1399_v34  ;;  %v1167_v47 = vrot.slane %v1117_v36, %v2558_v59 }
 0x4b0   : > { %1707 = vmatmul.mubr.msk.bf16.vlgmr.msra.gmra.mxu0 %vm798_vm13, %v1400_v38  ;;  %v1168_v8 = vsel %vm718_vm5, %v1167_v47, %v1163_v0 }
 0x4b1   : > { %v1123_v4 = vpop.permute.xlu1 %1122 }
 0x4b2   : > { %v1176_v12 = vrot.slane %v1123_v4, %v2558_v59 }
 0x4b4   : > { %v1177_v48 = vsel %vm718_vm5, %v1176_v12, %v1172_v28 }
 0x4b5   : > { %v1129_v40 = vpop.permute.xlu1 %1128  ;;  %v1232_v63 = vsel %vm783_vm6, %v1177_v48, %v1168_v8 }
 0x4b6   : > { %v1185_v42 = vrot.slane %v1129_v40, %v2558_v59 }
 0x4b8   : > { %v1186_v5 = vsel %vm718_vm5, %v1185_v42, %v1181_v62 }
 0x4b9   : > { %v1135_v43 = vpop.permute.xlu1 %1134  ;;  %v1233_v17 = vsel %vm785_vm7, %v1186_v5, %v1232_v63 }
 0x4ba   : > { %v1194_v56 = vrot.slane %v1135_v43, %v2558_v59 }
 0x4bc   : > { %v1195_v11 = vsel %vm718_vm5, %v1194_v56, %v1190_v1 }
 0x4bd   : > { %v1141_v45 = vpop.permute.xlu1 %1140  ;;  %v1234_v18 = vsel %vm787_vm8, %v1195_v11, %v1233_v17 }
 0x4be   : > { %v1203_v10 = vrot.slane %v1141_v45, %v2558_v59 }
 0x4c0   : > { %v1204_v16 = vsel %vm718_vm5, %v1203_v10, %v1199_v2 }
 0x4c1   : > { %v1147_v31 = vpop.permute.xlu1 %1146  ;;  %v1235_v41 = vsel %vm789_vm9, %v1204_v16, %v1234_v18 }
 0x4c2   : > { %v1212_v49 = vrot.slane %v1147_v31, %v2558_v59 }
 0x4c4   : > { %v1213_v52 = vsel %vm718_vm5, %v1212_v49, %v1208_v7 }
 0x4c5   : > { %v1153_v51 = vpop.permute.xlu1 %1152  ;;  %v1236_v19 = vsel %vm791_vm10, %v1213_v52, %v1235_v41 }
 0x4c6   : > { %v1221_v6 = vrot.slane %v1153_v51, %v2558_v59 }
 0x4c8   : > { %v1222_v50 = vsel %vm718_vm5, %v1221_v6, %v1217_v13 }
 0x4c9   : > { %v1159_v20 = vpop.permute.xlu1 %1158  ;;  %v1237_v21 = vsel %vm793_vm11, %v1222_v50, %v1236_v19 }
 0x4ca   : > { %v1230_v15 = vrot.slane %v1159_v20, %v2558_v59 }
 0x4cc   : > { %v1231_v9 = vsel %vm718_vm5, %v1230_v15, %v1226_v39 }
 0x4cd   : > { %v1238_v54 = vsel %vm795_vm12, %v1231_v9, %v1237_v21 }
 0x4ce   : > { %1240 = vst.msk [vmem:[%s366_s12] sm:$0xff] %vm798_vm13, %v1238_v54 }
 0x4cf   : > { %2043 = shalt.err (!%p2040_p9)
}
 0x4d0   : > { %s2044_s9 = scalar_lea.hbm %s1480_s2, 128  ;;  %s2048_s16 = scalar_lea.hbm %s3009_s18, 512 }
 0x4d1   : > { %p2045_p2 = scmp.ne.s32.totalorder %s1480_s2, %s2044_s9  ;;  %p2049_p5 = scmp.lt.s32.totalorder %s1480_s2, %s3009_s18 }
 0x4d2   : > { %p2050_p7 = scmp.lt.s32.totalorder %s2048_s16, %s2044_s9 }
 0x4d3   : > { %p2046_p1 = pnand %p2045_p2, %p3010_p10 }
 0x4d4   : > { %p2051_p11 = por %p2050_p7, %p2049_p5 }
 0x4d5   : > { %p2047_p6 = pneg %p2046_p1 }
 0x4d7   : > { %p2052_p0 = pnand %p2051_p11, %p2047_p6 }
 0x4d9   : > { %2055 = shalt.err (!%p2052_p0)
}
 0x4da   : > { %1723 = dma.vmem_to_hbm [thread:$0]  (%p3010_p10), %s1483_s24, 128, %s1480_s2, %s1452_s4  }
 0x4db   : > { %s359_s21 = scalar_lea.vmem [#allocation10], %s1660_s20  ;;  %s3011_s15 = sld [smem:[#allocation30_spill]] }
 0x4dc   : > { %s1467_s28 = sshll.u32 %s359_s21, 4  ;;  %s1447_s9 = scalar_lea.sflag [#allocation4], %s2447_s5  ;;  %s2892_s28 = int_to_ptr.vmem [resolvable:$true] %s1467_s28 }
 0x4dd   : > { %s2056_s2 = scalar_lea.vmem %s2892_s28, 128  ;;  %s2205_s20 = smov [#allocation10]  }
 0x4de   : > { %p2057_p4 = scmp.ne.s32.totalorder %s2892_s28, %s2056_s2  ;;  %s2060_s6 = sshll.u32 %s2205_s20, 4  ;;  %s2061_s6 = int_to_ptr.vmem [resolvable:$false] %s2060_s6 }
 0x4df   : > { %p2063_p13 = scmp.lt.s32.totalorder %s2892_s28, %s2061_s6 }
 0x4e0   : > { %p2058_p8 = pnand %p2057_p4, %p3010_p10 }
 0x4e1   : > { %s2890_s8 = scalar_lea.hbm %s3011_s15, %s1674_s27  ;;  %s2062_s27 = scalar_lea.vmem %s2061_s6, 256 }
 0x4e2   : > { %p2059_p12 = pneg %p2058_p8  ;;  %p2064_p3 = scmp.lt.s32.totalorder %s2062_s27, %s2056_s2 }
 0x4e4   : > { %p2065_p9 = por %p2064_p3, %p2063_p13 }
 0x4e6   : > { %p2066_p2 = pnand %p2065_p9, %p2059_p12 }
 0x570   : > { %v1439_v59 = vpop.f32.mrf.mxu0 }
 0x571   : > { %1445 = vst.msk [vmem:[%s359_s21] sm:$0xff] %vm392_vm3, %v1439_v59 }
 0x572   : > { %v1708_v61 = vpop.f32.mrf.mxu0 }
 0x573   : > { %2069 = shalt.err (!%p2066_p2)
}
 0x574   : > { %s2070_s24 = scalar_lea.hbm %s2890_s8, 128  ;;  %s2074_s11 = scalar_lea.hbm %s3011_s15, 512 }
 0x575   : > { %p2071_p1 = scmp.ne.s32.totalorder %s2890_s8, %s2070_s24  ;;  %p2075_p7 = scmp.lt.s32.totalorder %s2890_s8, %s3011_s15 }
 0x576   : > { %p2076_p11 = scmp.lt.s32.totalorder %s2074_s11, %s2070_s24 }
 0x577   : > { %p2072_p6 = pnand %p2071_p1, %p3010_p10 }
 0x578   : > { %p2077_p0 = por %p2076_p11, %p2075_p7 }
 0x579   : > { %p2073_p5 = pneg %p2072_p6 }
 0x57b   : > { %p2078_p4 = pnand %p2077_p0, %p2073_p5 }
 0x57d   : > { %2081 = shalt.err (!%p2078_p4)
}
 0x57e   : > { %1722 = dma.vmem_to_hbm [thread:$0]  (%p3010_p10), %s2892_s28, 128, %s2890_s8, %s1447_s9   ;;  %v1442_v57 = vpop.f32.mrf.mxu0 }
 0x580   : > { %v1709_v44 = vpop.f32.mrf.mxu0 }
 0x581 PF: > { %s3012_s12 = sld [smem:[#allocation19_spill]]  ;;  %p1752_p8 = scmp.ge.s32.totalorder %s2192_s7, 2 }
 0x582   : > { %s3013_s3 = sld [smem:[#allocation25_spill]] }
 0x587   : > { %s1494_s21 = sand.u32 1, %s3012_s12  }
 0x588   : > { %p3014_p12 = scmp.ne.s32.totalorder %s3013_s3, 0  ;;  %s1495_s10 = scalar_lea.sflag [#allocation4], %s1494_s21 }
 0x58a   : > { %p1741_p13 = pnand %p1752_p8, %p3014_p12 }
 0x58c   : > { %p1742_p3 = pneg %p1741_p13 }
 0x58e   : > { %2143 = dma.done.wait (%p1742_p3), %s1495_s10, 128  }
 0x58f   : > { %2145 = vsyncadd (%p1742_p3), %s1495_s10, 4294967168  ;;  %s1504_s14 = scalar_lea.sflag [#allocation12], %s1494_s21 }
 0x590   : > { %2147 = dma.done.wait (%p1742_p3), %s1504_s14, 128  }
 0x591   : > { %2149 = vsyncadd (%p1742_p3), %s1504_s14, 4294967168  ;;  %s30_s7 = sadd.s32 1, %s2192_s7   ;;  %s3015_s13 = sld [smem:[#allocation22_spill]] }
 0x592   : > { %p27_p10 = scmp.ge.s32.totalorder %s30_s7, 6   ;;  %s3016_s8 = sld [smem:[#allocation24_spill]] }
 0x593   : > { %s3017_s21 = smov %s2156_s22  ;;  %s3018_s22 = smov %s2160_s23 }
 0x594   : > { %s3019_s23 = smov %s2415_s0  ;;  %s3020_s24 = smov %s2168_s25 }
 0x595   : > { %s3021_s25 = smov %s2172_s26  ;;  %s3022_s26 = smov %s2412_s17 }
 0x596   : > { %s3023_s27 = smov %s2184_s29  ;;  %s3024_s28 = smov %s2188_s30 }
 0x597   : > { %s3025_s29 = smov %s3015_s13  ;;  %29 = sbr.rel (!%p27_p10) target bundleno = 21 (0x15), region = 123 }
 0x598   : > { %s3026_s30 = smov %s3016_s8 }
 0x59c   :  { %1509 = vsyncpa [#allocation3], 1 }
 0x59d   :  { %1511 = vsyncpa [#allocation3 + $0x1], 1 }
 0x59e   :  { %1512 = vsyncpa [#allocation6], 1 }
 0x59f   :  { %1514 = vsyncpa [#allocation6 + $0x1], 1 }
 0x5a0   :  { %1515 = vsyncpa [#allocation9], 1 }
 0x5a1   :  { %1516 = vsyncpa [#allocation4], 1 }
 0x5a2   :  { %1518 = vsyncpa [#allocation4 + $0x1], 1 }
 0x5a3   :  { %1519 = vsyncpa [#allocation12], 1 }
 0x5a4   :  { %1521 = vsyncpa [#allocation12 + $0x1], 1 }

</bundles_post_ra>
